<compile_context>
chip_gen: v5e
topology: v5e:2x2
jax: 0.10.0
libtpu: 0.0.40
codegen_flags: <defaults>
</compile_context>

<pallas_src>
import functools

import jax
import jax.numpy as jnp
from jax.experimental import pallas as pl
from jax.experimental.pallas import tpu as pltpu

LANES = 128
MAX_TILE_ROWS = 2048  # (2048, 128) f32 = 1 MiB per input block; ~6 MiB total VMEM w/ dbl-buf


def _masked_l1_kernel(pred_ref, target_ref, sum_ref, cnt_ref, acc_sum, acc_cnt,
                      *, blocks_per_outer, total_rows, needs_row_mask):
    k = pl.program_id(1)

    @pl.when(k == 0)
    def _init():
        acc_sum[...] = jnp.zeros_like(acc_sum)
        acc_cnt[...] = jnp.zeros_like(acc_cnt)

    # Load in native dtype, cast to f32 in-register (safe on v5e too).
    t = target_ref[...].astype(jnp.float32)
    p = pred_ref[...].astype(jnp.float32)

    valid = t > 0
    if needs_row_mask:
        # Only compiled in when the last block is partial or the grid has a padded
        # (clamped, re-read) tail; masks those rows out of both sum and count.
        blk = pl.program_id(0) * blocks_per_outer + k
        row_ids = blk * t.shape[0] + jax.lax.broadcasted_iota(jnp.int32, t.shape, 0)
        valid = jnp.logical_and(valid, row_ids < total_rows)

    # Pure elementwise (VPU) accumulation into VMEM vector accumulators.
    acc_sum[...] += jnp.where(valid, jnp.abs(t - p), jnp.float32(0.0))
    acc_cnt[...] += jnp.where(valid, jnp.float32(1.0), jnp.float32(0.0))

    @pl.when(k == pl.num_programs(1) - 1)
    def _finalize():
        sum_ref[...] = jnp.reshape(jnp.sum(acc_sum[...]), (1, 1, 1))
        cnt_ref[...] = jnp.reshape(jnp.sum(acc_cnt[...]), (1, 1, 1))


@jax.jit
def masked_l1_loss(pred, target):
    assert pred.ndim == target.ndim, "inconsistent dimensions"
    assert pred.shape == target.shape, "inconsistent dimensions"

    n = pred.size
    pred_f = jnp.ravel(pred)      # no dtype upcast here: stream native dtype from HBM
    target_f = jnp.ravel(target)

    # Lane-dense 2D layout (rows, 128). Reshape is free when n % 128 == 0; only pad
    # (an extra copy) for tiny / ragged inputs. Padded target=0 entries are naturally
    # excluded by the target > 0 mask.
    min_elems = 8 * LANES
    if n % LANES != 0 or n < min_elems:
        n_pad = max(pl.cdiv(n, LANES) * LANES, min_elems)
        pred_f = jnp.pad(pred_f, (0, n_pad - n))
        target_f = jnp.pad(target_f, (0, n_pad - n))

    rows = pred_f.size // LANES
    pred2d = pred_f.reshape(rows, LANES)
    target2d = target_f.reshape(rows, LANES)

    tile_rows = min(MAX_TILE_ROWS, (rows // 8) * 8)   # rows >= 8 guaranteed above
    n_blocks = pl.cdiv(rows, tile_rows)

    # Leading "parallel" axis: lets both TensorCores on v7x pull on HBM; harmless elsewhere.
    n_outer = 2 if n_blocks >= 2 else 1
    blocks_per_outer = pl.cdiv(n_blocks, n_outer)

    # Row masking only needed if the last block is partial or the grid over-covers.
    needs_row_mask = (rows % tile_rows != 0) or (n_outer * blocks_per_outer != n_blocks)

    def in_index(o, k):
        # Clamp so a padded grid tail never requests an out-of-range block; its
        # (re-read) data contributes zero via the in-kernel row mask.
        return (jnp.minimum(o * blocks_per_outer + k, n_blocks - 1), 0)

    kernel = functools.partial(
        _masked_l1_kernel,
        blocks_per_outer=blocks_per_outer,
        total_rows=rows,
        needs_row_mask=needs_row_mask,
    )

    partial_sums, partial_cnts = pl.pallas_call(
        kernel,
        out_shape=(
            jax.ShapeDtypeStruct((n_outer, 1, 1), jnp.float32),
            jax.ShapeDtypeStruct((n_outer, 1, 1), jnp.float32),
        ),
        grid_spec=pltpu.PrefetchScalarGridSpec(
            num_scalar_prefetch=0,
            grid=(n_outer, blocks_per_outer),
            in_specs=[
                pl.BlockSpec((tile_rows, LANES), in_index),
                pl.BlockSpec((tile_rows, LANES), in_index),
            ],
            out_specs=[
                pl.BlockSpec((1, 1, 1), lambda o, k: (o, 0, 0)),
                pl.BlockSpec((1, 1, 1), lambda o, k: (o, 0, 0)),
            ],
            scratch_shapes=[
                pltpu.VMEM((tile_rows, LANES), jnp.float32),  # partial |diff| sums
                pltpu.VMEM((tile_rows, LANES), jnp.float32),  # partial valid counts
            ],
        ),
        compiler_params=pltpu.CompilerParams(
            dimension_semantics=("parallel", "arbitrary"),
        ),
    )(pred2d, target2d)

    # Tiny final combine in the wrapper (NaN if no valid elements, matching torch).
    return jnp.sum(partial_sums) / jnp.sum(partial_cnts)


def masked_l1_loss_ref(pred, target):
    mask = target > 0
    diff = jnp.abs(target.astype(jnp.float32) - pred.astype(jnp.float32))
    s = jnp.sum(jnp.where(mask, diff, 0.0))
    c = jnp.sum(mask.astype(jnp.float32))
    return s / c


if __name__ == "__main__":
    key = jax.random.PRNGKey(0)
    k1, k2 = jax.random.split(key)
    B, C, H, W = 2, 4, 16, 16  # NCHW like the PyTorch module
    pred = jax.random.normal(k1, (B, C, H, W), dtype=jnp.float32)
    # target: mix of positive (valid) and non-positive (invalid) entries
    target = jax.random.normal(k2, (B, C, H, W), dtype=jnp.float32)

    out = masked_l1_loss(pred, target)
    jax.block_until_ready(out)

    ref = masked_l1_loss_ref(pred, target)
    assert jnp.allclose(out, ref, rtol=1e-5, atol=1e-6), (out, ref)
    print("KERNEL_OK")
</pallas_src>

<mosaic_0001>
module attributes {stable_mosaic.version = 11 : i64} {
  func.func @_masked_l1_kernel(%arg0: i32, %arg1: i32, %arg2: memref<16x128xf32, #tpu.memory_space<vmem>>, %arg3: memref<16x128xf32, #tpu.memory_space<vmem>>, %arg4: memref<1x1x1xf32, #tpu.memory_space<vmem>>, %arg5: memref<1x1x1xf32, #tpu.memory_space<vmem>>, %arg6: memref<16x128xf32, #tpu.memory_space<vmem>>, %arg7: memref<16x128xf32, #tpu.memory_space<vmem>>) attributes {dimension_semantics = [#tpu.dimension_semantics<parallel>, #tpu.dimension_semantics<arbitrary>], iteration_bounds = array<i64: 1, 1>, scalar_prefetch = 0 : i64, scratch_operands = 2 : i64, tpu.core_type = #tpu.core_type<tc>, window_params = [{transform_indices = @transform_0, window_bounds = array<i64: 16, 128>}, {transform_indices = @transform_1, window_bounds = array<i64: 16, 128>}, {transform_indices = @transform_2, window_bounds = array<i64: 1, 1, 1>}, {transform_indices = @transform_3, window_bounds = array<i64: 1, 1, 1>}]} {
    %c0_i32 = arith.constant 0 : i32
    %0 = arith.cmpi eq, %arg1, %c0_i32 : i32
    %1 = arith.extui %0 : i1 to i32
    %c0_i32_0 = arith.constant 0 : i32
    %2 = arith.cmpi ne, %1, %c0_i32_0 : i32
    scf.if %2 {
      %cst_17 = arith.constant 0.000000e+00 : f32
      %23 = vector.broadcast %cst_17 : f32 to vector<16x128xf32>
      %c0_18 = arith.constant 0 : index
      %c0_19 = arith.constant 0 : index
      %24 = vector.load %arg6[%c0_18, %c0_19] : memref<16x128xf32, #tpu.memory_space<vmem>>, vector<16x128xf32>
      tpu.vector_store %arg6[%c0_18, %c0_19], %23 {strides = array<i32>} : memref<16x128xf32, #tpu.memory_space<vmem>>, vector<16x128xf32>,
      %cst_20 = arith.constant 0.000000e+00 : f32
      %25 = vector.broadcast %cst_20 : f32 to vector<16x128xf32>
      %c0_21 = arith.constant 0 : index
      %c0_22 = arith.constant 0 : index
      %26 = vector.load %arg7[%c0_21, %c0_22] : memref<16x128xf32, #tpu.memory_space<vmem>>, vector<16x128xf32>
      tpu.vector_store %arg7[%c0_21, %c0_22], %25 {strides = array<i32>} : memref<16x128xf32, #tpu.memory_space<vmem>>, vector<16x128xf32>,
    } else {
    }
    %c0 = arith.constant 0 : index
    %c0_1 = arith.constant 0 : index
    %3 = vector.load %arg3[%c0, %c0_1] : memref<16x128xf32, #tpu.memory_space<vmem>>, vector<16x128xf32>
    %c0_2 = arith.constant 0 : index
    %c0_3 = arith.constant 0 : index
    %4 = vector.load %arg2[%c0_2, %c0_3] : memref<16x128xf32, #tpu.memory_space<vmem>>, vector<16x128xf32>
    %cst = arith.constant 0.000000e+00 : f32
    %5 = vector.broadcast %cst : f32 to vector<16x128xf32>
    %6 = arith.cmpf ogt, %3, %5 : vector<16x128xf32>
    %c0_4 = arith.constant 0 : index
    %c0_5 = arith.constant 0 : index
    %7 = vector.load %arg6[%c0_4, %c0_5] : memref<16x128xf32, #tpu.memory_space<vmem>>, vector<16x128xf32>
    %8 = arith.subf %3, %4 : vector<16x128xf32>
    %9 = math.absf %8 : vector<16x128xf32>
    %cst_6 = arith.constant 0.000000e+00 : f32
    %10 = vector.broadcast %cst_6 : f32 to vector<16x128xf32>
    %11 = arith.select %6, %9, %10 : vector<16x128xi1>, vector<16x128xf32>
    %12 = arith.addf %7, %11 : vector<16x128xf32>
    %c0_7 = arith.constant 0 : index
    %c0_8 = arith.constant 0 : index
    %13 = vector.load %arg6[%c0_7, %c0_8] : memref<16x128xf32, #tpu.memory_space<vmem>>, vector<16x128xf32>
    tpu.vector_store %arg6[%c0_7, %c0_8], %12 {strides = array<i32>} : memref<16x128xf32, #tpu.memory_space<vmem>>, vector<16x128xf32>,
    %c0_9 = arith.constant 0 : index
    %c0_10 = arith.constant 0 : index
    %14 = vector.load %arg7[%c0_9, %c0_10] : memref<16x128xf32, #tpu.memory_space<vmem>>, vector<16x128xf32>
    %cst_11 = arith.constant 1.000000e+00 : f32
    %cst_12 = arith.constant 0.000000e+00 : f32
    %15 = vector.broadcast %cst_11 : f32 to vector<16x128xf32>
    %16 = vector.broadcast %cst_12 : f32 to vector<16x128xf32>
    %17 = arith.select %6, %15, %16 : vector<16x128xi1>, vector<16x128xf32>
    %18 = arith.addf %14, %17 : vector<16x128xf32>
    %c0_13 = arith.constant 0 : index
    %c0_14 = arith.constant 0 : index
    %19 = vector.load %arg7[%c0_13, %c0_14] : memref<16x128xf32, #tpu.memory_space<vmem>>, vector<16x128xf32>
    tpu.vector_store %arg7[%c0_13, %c0_14], %18 {strides = array<i32>} : memref<16x128xf32, #tpu.memory_space<vmem>>, vector<16x128xf32>,
    %c0_i32_15 = arith.constant 0 : i32
    %20 = arith.cmpi eq, %arg1, %c0_i32_15 : i32
    %21 = arith.extui %20 : i1 to i32
    %c0_i32_16 = arith.constant 0 : i32
    %22 = arith.cmpi ne, %21, %c0_i32_16 : i32
    scf.if %22 {
      %c0_17 = arith.constant 0 : index
      %c0_18 = arith.constant 0 : index
      %23 = vector.load %arg6[%c0_17, %c0_18] : memref<16x128xf32, #tpu.memory_space<vmem>>, vector<16x128xf32>
      %24 = vector.shape_cast %23 : vector<16x128xf32> to vector<1x16x128xf32>
      %cst_19 = arith.constant dense<0.000000e+00> : vector<1xf32>
      %25 = vector.multi_reduction <add>, %24, %cst_19 [1, 2] : vector<1x16x128xf32> to vector<1xf32>
      %26 = vector.shape_cast %25 : vector<1xf32> to vector<1x1x1xf32>
      %27 = vector.extract %26[0, 0, 0] : f32 from vector<1x1x1xf32>
      %28 = vector.broadcast %27 : f32 to vector<1x1x1xf32>
      %c0_20 = arith.constant 0 : index
      %c0_21 = arith.constant 0 : index
      %c0_22 = arith.constant 0 : index
      %29 = vector.load %arg4[%c0_20, %c0_21, %c0_22] : memref<1x1x1xf32, #tpu.memory_space<vmem>>, vector<1x1x1xf32>
      tpu.vector_store %arg4[%c0_20, %c0_21, %c0_22], %28 {strides = array<i32>} : memref<1x1x1xf32, #tpu.memory_space<vmem>>, vector<1x1x1xf32>,
      %c0_23 = arith.constant 0 : index
      %c0_24 = arith.constant 0 : index
      %30 = vector.load %arg7[%c0_23, %c0_24] : memref<16x128xf32, #tpu.memory_space<vmem>>, vector<16x128xf32>
      %31 = vector.shape_cast %30 : vector<16x128xf32> to vector<1x16x128xf32>
      %cst_25 = arith.constant dense<0.000000e+00> : vector<1xf32>
      %32 = vector.multi_reduction <add>, %31, %cst_25 [1, 2] : vector<1x16x128xf32> to vector<1xf32>
      %33 = vector.shape_cast %32 : vector<1xf32> to vector<1x1x1xf32>
      %34 = vector.extract %33[0, 0, 0] : f32 from vector<1x1x1xf32>
      %35 = vector.broadcast %34 : f32 to vector<1x1x1xf32>
      %c0_26 = arith.constant 0 : index
      %c0_27 = arith.constant 0 : index
      %c0_28 = arith.constant 0 : index
      %36 = vector.load %arg5[%c0_26, %c0_27, %c0_28] : memref<1x1x1xf32, #tpu.memory_space<vmem>>, vector<1x1x1xf32>
      tpu.vector_store %arg5[%c0_26, %c0_27, %c0_28], %35 {strides = array<i32>} : memref<1x1x1xf32, #tpu.memory_space<vmem>>, vector<1x1x1xf32>,
    } else {
    }
    return
  }
  func.func @transform_0(%arg0: i32, %arg1: i32) -> (i32, i32) {
    %c1_i32 = arith.constant 1 : i32
    %0 = arith.muli %arg0, %c1_i32 : i32
    %1 = arith.addi %0, %arg1 : i32
    %c0_i32 = arith.constant 0 : i32
    %2 = arith.minsi %1, %c0_i32 : i32
    %c0_i32_0 = arith.constant 0 : i32
    %c0_i32_1 = arith.constant 0 : i32
    return %2, %c0_i32_0 : i32, i32
  }
  func.func @transform_1(%arg0: i32, %arg1: i32) -> (i32, i32) {
    %c1_i32 = arith.constant 1 : i32
    %0 = arith.muli %arg0, %c1_i32 : i32
    %1 = arith.addi %0, %arg1 : i32
    %c0_i32 = arith.constant 0 : i32
    %2 = arith.minsi %1, %c0_i32 : i32
    %c0_i32_0 = arith.constant 0 : i32
    %c0_i32_1 = arith.constant 0 : i32
    return %2, %c0_i32_0 : i32, i32
  }
  func.func @transform_2(%arg0: i32, %arg1: i32) -> (i32, i32, i32) {
    %c0_i32 = arith.constant 0 : i32
    %c0_i32_0 = arith.constant 0 : i32
    %c0_i32_1 = arith.constant 0 : i32
    return %arg0, %c0_i32, %c0_i32_0 : i32, i32, i32
  }
  func.func @transform_3(%arg0: i32, %arg1: i32) -> (i32, i32, i32) {
    %c0_i32 = arith.constant 0 : i32
    %c0_i32_0 = arith.constant 0 : i32
    %c0_i32_1 = arith.constant 0 : i32
    return %arg0, %c0_i32, %c0_i32_0 : i32, i32, i32
  }
}

</mosaic_0001>

<bundles_post_ra>
// kernel: masked_l1_loss.1
= control target key start
LH: loop header
LB: loop body
LE: loop exit
PB: predicated region body
PF: predicated region fallthrough
CT: control target
= control target key end

     0   :  { %9 = vsyncpa [#allocation5], 0  ;;  %s289_s0 = inlined_call_operand.vmem [shape: f32[16,128], index: 0, kind: input, shape index: {}]   ;;  %s290_s1 = inlined_call_operand.vmem [shape: f32[16,128], index: 1, kind: input, shape index: {}]   ;;  %s291_s2 = inlined_call_operand.hbm [shape: f32[1,1,1], index: 2, kind: output, shape index: {0}]   ;;  %s292_s3 = inlined_call_operand.hbm [shape: f32[1,1,1], index: 3, kind: output, shape index: {1}]  }
   0x1   :  { %v87_v0 = vld [vmem:[%s290_s1] sm:$0xff]  ;;  %v88_v1 = vld [vmem:[%s290_s1 + $0x8] sm:$0xff] }
   0x2   :  { %v89_v2 = vld [vmem:[%s289_s0] sm:$0xff]  ;;  %v90_v3 = vld [vmem:[%s289_s0 + $0x8] sm:$0xff] }
   0x3   :  { %v95_v4 = vsub.f32 %v87_v0, %v89_v2 }
   0x4   :  { %10 = vsyncpa [#allocation7], 0  ;;  %vm91_vm0 = vcmp.gt.f32.partialorder %v87_v0, 0.0  ;;  %v96_v5 = vsub.f32 %v88_v1, %v90_v3  ;;  %vm92_vm1 = vcmp.gt.f32.partialorder %v88_v1, 0.0  ;;  %v248_v11 = vmov 0.0   ;;  %s249_s0 = smov [#allocation4]  }
   0x5   :  { %v97_v6 = vand.u32 2147483647, %v95_v4  ;;  %v107_v12 = vsel %vm91_vm0, 1.0, %v248_v11  ;;  %v108_v13 = vsel %vm92_vm1, 1.0, %v248_v11  ;;  %s150_s1 = sshll.u32 %s249_s0, 4  ;;  %s152_s22 = sshll.u32 %s291_s2, 4  ;;  %s151_s1 = int_to_ptr.vmem [resolvable:$true] %s150_s1  ;;  %s153_s22 = int_to_ptr.hbm [resolvable:$true] %s152_s22 }
   0x6   :  { %v98_v7 = vand.u32 2147483647, %v96_v5  ;;  %v133_v14 = vadd.f32 %v108_v13, %v107_v12  ;;  %vm129_vm2 = vcmask 0   ;;  %s250_s24 = smov [#allocation6]   ;;  %s163_s28 = sshll.u32 %s292_s3, 4  ;;  %s164_s28 = int_to_ptr.hbm [resolvable:$true] %s163_s28 }
   0x7   :  { %v99_v8 = vsel %vm91_vm0, %v97_v6, 0.0  ;;  %s161_s25 = sshll.u32 %s250_s24, 4  ;;  %s162_s25 = int_to_ptr.vmem [resolvable:$true] %s161_s25 }
   0x8   :  { %v100_v9 = vsel %vm92_vm1, %v98_v7, 0.0 }
   0x9   :  { %v118_v10 = vadd.f32 %v100_v9, %v99_v8 }
   0xb   :  { %119 = vadd.xlane.f32.xlu0 %v118_v10 }
  0x13   :  { %134 = vadd.xlane.f32.xlu0 %v133_v14 }
  0x7e   :  { %v120_v15 = vpop.xlane.xlu0 %119 }
  0x7f   :  { %v121_v16 = vrot.slane %v120_v15, 4 }
  0x81   :  { %v122_v17 = vadd.f32 %v121_v16, %v120_v15 }
  0x83   :  { %v123_v18 = vrot.slane %v122_v17, 2 }
  0x85   :  { %v124_v19 = vadd.f32 %v123_v18, %v122_v17 }
  0x86   :  { %v135_v20 = vpop.xlane.xlu0 %134 }
  0x87   :  { %v136_v21 = vrot.slane %v135_v20, 4  ;;  %v125_v22 = vrot.slane %v124_v19, 1 }
  0x89   :  { %v137_v23 = vadd.f32 %v136_v21, %v135_v20  ;;  %v126_v24 = vadd.f32 %v125_v22, %v124_v19 }
  0x8b   :  { %v138_v25 = vrot.slane %v137_v23, 2  ;;  %189 = vpush %v126_v24 }
  0x8d   :  { %v139_v26 = vadd.f32 %v138_v25, %v137_v23 }
  0x8f   :  { %v140_v27 = vrot.slane %v139_v26, 1 }
  0x91   :  { %v141_v28 = vadd.f32 %v140_v27, %v139_v26 }
  0x93   :  { %191 = vpush %v141_v28 }
  0xbc   :  { %s190_s23 = spop %189 }
  0xbd   :  { %v128_v29 = vstv %s190_s23 }
  0xbe   :  { %130 = vst.msk [vmem:[#allocation4] sm:$0x1] %vm129_vm2, %v128_v29 }
  0xbf   :  { %155 = dma.vmem_to_hbm [thread:$0]  %s151_s1, 16, %s153_s22, [#allocation5]  }
  0xc4   :  { %s192_s29 = spop %191 }
  0xc5   :  { %v143_v30 = vstv %s192_s29 }
  0xc6   :  { %144 = vst.msk [vmem:[#allocation6] sm:$0x1] %vm129_vm2, %v143_v30 }
  0xc7   :  { %166 = dma.vmem_to_hbm [thread:$0]  %s162_s25, 16, %s164_s28, [#allocation7]  }
  0xc8   :  { %244 = dma.done.wait [#allocation5], 16  }
  0xc9   :  { %245 = vsyncadd [#allocation5], 4294967280 }
  0xca   :  { %246 = dma.done.wait [#allocation7], 16  }
  0xcb   :  { %247 = vsyncadd [#allocation7], 4294967280 }
  0xcc   :  { %175 = vsyncpa [#allocation5], 1 }
  0xcd   :  { %176 = vsyncpa [#allocation7], 1 }

</bundles_post_ra>
